<compile_context>
chip_gen: v7x
topology: tpu7x:2x2x1
jax: 0.10.0
libtpu: 0.0.40
codegen_flags: <defaults>
</compile_context>

<pallas_src>
import jax
import jax.numpy as jnp
from jax.experimental import pallas as pl
from jax.experimental.pallas import tpu as pltpu


def _time_embedding_kernel(x_ref, w1_ref, b1_ref, w2_ref, b2_ref, o_ref):
    # linear_1: (B, E) @ (E, H) -> (B, H), f32 accumulation.
    x = x_ref[...].astype(w1_ref.dtype)
    h = jnp.dot(x, w1_ref[...], preferred_element_type=jnp.float32)
    h = h + b1_ref[...]                      # bias in f32
    # SiLU in f32 (EUP sigmoid rides a free slot on this DMA-bound kernel).
    h = h * jax.nn.sigmoid(h)
    # linear_2, one output-column tile: (B, H) @ (H, TN) -> (B, TN).
    out = jnp.dot(h.astype(w2_ref.dtype), w2_ref[...],
                  preferred_element_type=jnp.float32)
    out = out + b2_ref[...]
    o_ref[...] = out.astype(o_ref.dtype)


def prepare_time_embedding_params(w1, b1, w2, b2, weight_dtype=jnp.bfloat16):
    """One-time (model-init) parameter prep.

    Converts PyTorch nn.Linear layout (out, in) / (out,) into the kernel layout:
      w1 -> (E, H) weight_dtype, w2 -> (H, H) weight_dtype (pre-transposed once),
      b1, b2 -> (1, H) f32 row vectors.
    """
    H, E = w1.shape
    assert w2.shape == (H, H) and b1.shape == (H,) and b2.shape == (H,)
    w1_t = jnp.asarray(w1, weight_dtype).T          # (E, H)
    w2_t = jnp.asarray(w2, weight_dtype).T          # (H, H)
    b1_r = jnp.asarray(b1, jnp.float32).reshape(1, H)
    b2_r = jnp.asarray(b2, jnp.float32).reshape(1, H)
    return w1_t, b1_r, w2_t, b2_r


def _num_tensorcores() -> int:
    """Heuristic: split the output-column axis across TCs only on multi-TC chips."""
    try:
        kind = jax.devices()[0].device_kind.lower()
    except Exception:
        return 1
    return 2 if "v7" in kind else 1


def time_embedding(x, w1_t, b1_r, w2_t, b2_r):
    """TimeEmbedding forward.

    x    : (B, E)  f32 (or bf16) time embedding input
    w1_t : (E, H)  weight_dtype   (pre-transposed, see prepare_time_embedding_params)
    b1_r : (1, H)  f32
    w2_t : (H, H)  weight_dtype
    b2_r : (1, H)  f32
    """
    B, E = x.shape
    H = w1_t.shape[1]
    assert w1_t.shape == (E, H) and w2_t.shape == (H, H)
    assert b1_r.shape == (1, H) and b2_r.shape == (1, H)

    # dtype-aware sublane pad: 8 rows/vreg-tile for f32, 16 for packed bf16.
    row_pad = 16 if x.dtype == jnp.bfloat16 else 8
    B_pad = max(row_pad, ((B + row_pad - 1) // row_pad) * row_pad)
    if B_pad != B:
        x = jnp.pad(x, ((0, B_pad - B), (0, 0)))

    # One output-column tile per TensorCore. Fall back to a single block if H
    # can't be split into lane-aligned (multiple-of-128) halves.
    n_tiles = _num_tensorcores()
    if n_tiles > 1 and (H % (128 * n_tiles) != 0):
        n_tiles = 1
    tn = H // n_tiles
    grid = (n_tiles,)

    wbytes = w1_t.dtype.itemsize
    bytes_accessed = int(
        x.size * x.dtype.itemsize
        + w1_t.size * wbytes
        + w2_t.size * wbytes
        + (b1_r.size + b2_r.size) * 4
        + B_pad * H * x.dtype.itemsize
    )
    # matmul1 + SiLU are recomputed once per tile; matmul2 is split across tiles.
    cost = pl.CostEstimate(
        flops=2 * B_pad * E * H * n_tiles + 2 * B_pad * H * H,
        transcendentals=B_pad * H * n_tiles,
        bytes_accessed=bytes_accessed,
    )

    out = pl.pallas_call(
        _time_embedding_kernel,
        out_shape=jax.ShapeDtypeStruct((B_pad, H), x.dtype),
        grid_spec=pltpu.PrefetchScalarGridSpec(
            num_scalar_prefetch=0,
            grid=grid,
            in_specs=[
                pl.BlockSpec((B_pad, E), lambda j: (0, 0)),  # x   (resident)
                pl.BlockSpec((E, H), lambda j: (0, 0)),      # w1  (resident)
                pl.BlockSpec((1, H), lambda j: (0, 0)),      # b1  (resident)
                pl.BlockSpec((H, tn), lambda j: (0, j)),     # w2 column tile
                pl.BlockSpec((1, tn), lambda j: (0, j)),     # b2 column tile
            ],
            out_specs=pl.BlockSpec((B_pad, tn), lambda j: (0, j)),
        ),
        compiler_params=pltpu.CompilerParams(
            dimension_semantics=("parallel",),
        ),
        cost_estimate=cost,
    )(x, w1_t, b1_r, w2_t, b2_r)

    return out[:B]


def _reference(x, w1, b1, w2, b2, weight_dtype=jnp.bfloat16):
    """Plain-JAX reference on the PyTorch (out,in) layout with the same precision
    recipe (bf16 MXU operands, f32 accumulation, f32 SiLU)."""
    w1b = jnp.asarray(w1, weight_dtype)
    w2b = jnp.asarray(w2, weight_dtype)
    h = jnp.dot(x.astype(weight_dtype), w1b.T, preferred_element_type=jnp.float32)
    h = h + b1.astype(jnp.float32)
    h = h * jax.nn.sigmoid(h)
    out = jnp.dot(h.astype(weight_dtype), w2b.T, preferred_element_type=jnp.float32)
    out = out + b2.astype(jnp.float32)
    return out.astype(x.dtype)


if __name__ == "__main__":
    # Small stand-in shapes for the real TimeEmbedding(320): n_embed=64 -> H=256
    # (H divisible by 256, so both the 2-tile v7x path and the single-block path
    # are exercisable depending on the host chip).
    n_embed = 64
    batch = 2
    H = 4 * n_embed

    key = jax.random.PRNGKey(0)
    kx, k1, k2, k3, k4 = jax.random.split(key, 5)

    x = jax.random.normal(kx, (batch, n_embed), dtype=jnp.float32)
    # PyTorch nn.Linear convention: weight (out, in), bias (out,).
    w1 = jax.random.normal(k1, (H, n_embed), dtype=jnp.float32) * 0.05
    b1 = jax.random.normal(k2, (H,), dtype=jnp.float32) * 0.05
    w2 = jax.random.normal(k3, (H, H), dtype=jnp.float32) * 0.05
    b2 = jax.random.normal(k4, (H,), dtype=jnp.float32) * 0.05

    # One-time init conversion (transpose + bf16 cast) — not per call.
    w1_t, b1_r, w2_t, b2_r = prepare_time_embedding_params(w1, b1, w2, b2)

    out = jax.block_until_ready(time_embedding(x, w1_t, b1_r, w2_t, b2_r))
    ref = _reference(x, w1, b1, w2, b2)

    assert out.shape == (batch, H), out.shape
    assert jnp.allclose(out, ref, atol=5e-3, rtol=5e-3), "mismatch vs reference"

    print("KERNEL_OK")
</pallas_src>

<mosaic_0001>
module attributes {stable_mosaic.version = 11 : i64} {
  func.func @_time_embedding_kernel(%arg0: i32, %arg1: memref<8x64xf32, #tpu.memory_space<vmem>>, %arg2: memref<64x256xbf16, #tpu.memory_space<vmem>>, %arg3: memref<1x256xf32, #tpu.memory_space<vmem>>, %arg4: memref<256x256xbf16, #tpu.memory_space<vmem>>, %arg5: memref<1x256xf32, #tpu.memory_space<vmem>>, %arg6: memref<8x256xf32, #tpu.memory_space<vmem>>) attributes {dimension_semantics = [#tpu.dimension_semantics<parallel>], iteration_bounds = array<i64: 1>, scalar_prefetch = 0 : i64, scratch_operands = 0 : i64, tpu.core_type = #tpu.core_type<tc>, window_params = [{pipeline_mode = #tpu.pipeline_mode<synchronous>, transform_indices = @transform_0, window_bounds = array<i64: 8, 64>}, {pipeline_mode = #tpu.pipeline_mode<synchronous>, transform_indices = @transform_1, window_bounds = array<i64: 64, 256>}, {pipeline_mode = #tpu.pipeline_mode<synchronous>, transform_indices = @transform_2, window_bounds = array<i64: 1, 256>}, {transform_indices = @transform_3, window_bounds = array<i64: 256, 256>}, {transform_indices = @transform_4, window_bounds = array<i64: 1, 256>}, {transform_indices = @transform_5, window_bounds = array<i64: 8, 256>}]} {
    %c0 = arith.constant 0 : index
    %c0_0 = arith.constant 0 : index
    %0 = vector.load %arg1[%c0, %c0_0] : memref<8x64xf32, #tpu.memory_space<vmem>>, vector<8x64xf32>
    %1 = arith.truncf %0 : vector<8x64xf32> to vector<8x64xbf16>
    %c0_1 = arith.constant 0 : index
    %c0_2 = arith.constant 0 : index
    %2 = vector.load %arg2[%c0_1, %c0_2] : memref<64x256xbf16, #tpu.memory_space<vmem>>, vector<64x256xbf16>
    %cst = arith.constant dense<0.000000e+00> : vector<8x256xf32>
    %3 = tpu.matmul %1, %2, %cst {dimension_numbers = #tpu.dot_dimension_numbers<[1], [0], [0], [1], [0, 0, 1, 1], [], []>} : vector<8x64xbf16>, vector<64x256xbf16>, vector<8x256xf32> -> vector<8x256xf32>
    %c0_3 = arith.constant 0 : index
    %c0_4 = arith.constant 0 : index
    %4 = vector.load %arg3[%c0_3, %c0_4] : memref<1x256xf32, #tpu.memory_space<vmem>>, vector<1x256xf32>
    %5 = vector.broadcast %4 : vector<1x256xf32> to vector<8x256xf32>
    %6 = arith.addf %3, %5 : vector<8x256xf32>
    %7 = arith.negf %6 : vector<8x256xf32>
    %8 = math.exp %7 : vector<8x256xf32>
    %cst_5 = arith.constant 1.000000e+00 : f32
    %9 = vector.broadcast %cst_5 : f32 to vector<8x256xf32>
    %10 = arith.addf %9, %8 : vector<8x256xf32>
    %11 = arith.divf %9, %10 : vector<8x256xf32>
    %12 = arith.mulf %6, %11 : vector<8x256xf32>
    %13 = arith.truncf %12 : vector<8x256xf32> to vector<8x256xbf16>
    %c0_6 = arith.constant 0 : index
    %c0_7 = arith.constant 0 : index
    %14 = vector.load %arg4[%c0_6, %c0_7] : memref<256x256xbf16, #tpu.memory_space<vmem>>, vector<256x256xbf16>
    %cst_8 = arith.constant dense<0.000000e+00> : vector<8x256xf32>
    %15 = tpu.matmul %13, %14, %cst_8 {dimension_numbers = #tpu.dot_dimension_numbers<[1], [0], [0], [1], [0, 0, 1, 1], [], []>} : vector<8x256xbf16>, vector<256x256xbf16>, vector<8x256xf32> -> vector<8x256xf32>
    %c0_9 = arith.constant 0 : index
    %c0_10 = arith.constant 0 : index
    %16 = vector.load %arg5[%c0_9, %c0_10] : memref<1x256xf32, #tpu.memory_space<vmem>>, vector<1x256xf32>
    %17 = vector.broadcast %16 : vector<1x256xf32> to vector<8x256xf32>
    %18 = arith.addf %15, %17 : vector<8x256xf32>
    %c0_11 = arith.constant 0 : index
    %c0_12 = arith.constant 0 : index
    %19 = vector.load %arg6[%c0_11, %c0_12] : memref<8x256xf32, #tpu.memory_space<vmem>>, vector<8x256xf32>
    tpu.vector_store %arg6[%c0_11, %c0_12], %18 {strides = array<i32>} : memref<8x256xf32, #tpu.memory_space<vmem>>, vector<8x256xf32>,
    return
  }
  func.func @transform_0(%arg0: i32) -> (i32, i32) {
    %c0_i32 = arith.constant 0 : i32
    %c0_i32_0 = arith.constant 0 : i32
    %c0_i32_1 = arith.constant 0 : i32
    return %c0_i32, %c0_i32_0 : i32, i32
  }
  func.func @transform_1(%arg0: i32) -> (i32, i32) {
    %c0_i32 = arith.constant 0 : i32
    %c0_i32_0 = arith.constant 0 : i32
    %c0_i32_1 = arith.constant 0 : i32
    return %c0_i32, %c0_i32_0 : i32, i32
  }
  func.func @transform_2(%arg0: i32) -> (i32, i32) {
    %c0_i32 = arith.constant 0 : i32
    %c0_i32_0 = arith.constant 0 : i32
    %c0_i32_1 = arith.constant 0 : i32
    return %c0_i32, %c0_i32_0 : i32, i32
  }
  func.func @transform_3(%arg0: i32) -> (i32, i32) {
    %c0_i32 = arith.constant 0 : i32
    %c0_i32_0 = arith.constant 0 : i32
    return %c0_i32, %arg0 : i32, i32
  }
  func.func @transform_4(%arg0: i32) -> (i32, i32) {
    %c0_i32 = arith.constant 0 : i32
    %c0_i32_0 = arith.constant 0 : i32
    return %c0_i32, %arg0 : i32, i32
  }
  func.func @transform_5(%arg0: i32) -> (i32, i32) {
    %c0_i32 = arith.constant 0 : i32
    %c0_i32_0 = arith.constant 0 : i32
    return %c0_i32, %arg0 : i32, i32
  }
}

</mosaic_0001>

<bundles_post_ra>
// kernel: tpu_custom_call.1
= control target key start
LH: loop header
LB: loop body
LE: loop exit
PB: predicated region body
PF: predicated region fallthrough
CT: control target
= control target key end

     0   :  { %10 = vsyncpa [#allocation3], 0  ;;  %s756_s0 = inlined_call_operand.hbm [shape: f32[8,64], index: 0, kind: input, shape index: {}]   ;;  %s757_s1 = inlined_call_operand.hbm [shape: bf16[64,256], index: 1, kind: input, shape index: {}]   ;;  %s758_s2 = inlined_call_operand.vmem [shape: f32[1,256], index: 2, kind: input, shape index: {}]   ;;  %s759_s3 = inlined_call_operand.hbm [shape: bf16[256,256], index: 3, kind: input, shape index: {}]   ;;  %s760_s4 = inlined_call_operand.vmem [shape: f32[1,256], index: 4, kind: input, shape index: {}]   ;;  %s761_s5 = inlined_call_operand.hbm [shape: f32[8,256], index: 5, kind: output, shape index: {}]  }
   0x1   :  { %11 = vsyncpa [#allocation6], 0 }
   0x2   :  { %12 = vsyncpa [#allocation4], 0  ;;  %s659_s18 = smov [#allocation5]   ;;  %s565_s22 = scalar_lea.hbm %s757_s1, 1024 }
   0x3   :  { %s28_s19 = sshll.u32 %s659_s18, 4  ;;  %p566_p0 = scmp.ne.s32.totalorder %s757_s1, %s565_s22  ;;  %s29_s19 = int_to_ptr.vmem [resolvable:$true] %s28_s19 }
   0x4   :  { %p569_p1 = scmp.lt.u32.totalorder %s565_s22, %s757_s1 }
   0x6   :  { %p571_p2 = pnand %p569_p1, %p566_p0 }
   0x8   :  { %574 = shalt.err (!%p571_p2)
}
   0x9   :  { %s575_s27 = scalar_lea.vmem %s29_s19, 1024  ;;  %p580_p4 = scmp.lt.s32.totalorder %s29_s19, %s29_s19 }
   0xa   :  { %p576_p3 = scmp.ne.s32.totalorder %s29_s19, %s575_s27  ;;  %p581_p5 = scmp.lt.s32.totalorder %s575_s27, %s575_s27 }
   0xc   :  { %p582_p6 = por %p581_p5, %p580_p4 }
   0xe   :  { %p583_p7 = pnand %p582_p6, %p576_p3 }
  0x10   :  { %586 = shalt.err (!%p583_p7)
}
  0x11   :  { %s660_s28 = smov 128   ;;  %s661_s29 = smov 8  }
  0x12   :  { %34 = dma.hbm_to_vmem [thread:$0]  %s757_s1, 1024, %s29_s19, [#allocation6], %s660_s28, %s660_s28, %s661_s29  }
  0x13   :  { %s662_s7 = smov [#allocation2]   ;;  %s663_s9 = smov [#allocation7]  }
  0x14   :  { %s19_s8 = sshll.u32 %s662_s7, 4  ;;  %s42_s10 = sshll.u32 %s663_s9, 4  ;;  %s20_s8 = int_to_ptr.vmem [resolvable:$true] %s19_s8  ;;  %s43_s10 = int_to_ptr.vmem [resolvable:$true] %s42_s10 }
  0x15   :  { %s587_s13 = scalar_lea.hbm %s756_s0, 128 }
  0x16   :  { %p588_p8 = scmp.ne.s32.totalorder %s756_s0, %s587_s13  ;;  %p591_p9 = scmp.lt.u32.totalorder %s587_s13, %s756_s0 }
  0x18   :  { %p593_p10 = pnand %p591_p9, %p588_p8 }
  0x1a   :  { %596 = shalt.err (!%p593_p10)
}
  0x1b   :  { %s597_s1 = scalar_lea.vmem %s20_s8, 128  ;;  %p602_p12 = scmp.lt.s32.totalorder %s20_s8, %s20_s8 }
  0x1c   :  { %p598_p11 = scmp.ne.s32.totalorder %s20_s8, %s597_s1  ;;  %p603_p13 = scmp.lt.s32.totalorder %s597_s1, %s597_s1 }
  0x1e   :  { %p604_p0 = por %p603_p13, %p602_p12 }
  0x20   :  { %p605_p1 = pnand %p604_p0, %p598_p11 }
  0x22   :  { %608 = shalt.err (!%p605_p1)
}
  0x23   :  { %22 = dma.hbm_to_vmem [thread:$0]  %s756_s0, 128, %s20_s8, [#allocation3]  }
  0x24   :  { %s609_s22 = scalar_lea.hbm %s759_s3, 4096 }
  0x25   :  { %p610_p2 = scmp.ne.s32.totalorder %s759_s3, %s609_s22  ;;  %p613_p3 = scmp.lt.u32.totalorder %s609_s22, %s759_s3 }
  0x27   :  { %p615_p4 = pnand %p613_p3, %p610_p2 }
  0x29   :  { %618 = shalt.err (!%p615_p4)
}
  0x2a   :  { %s619_s27 = scalar_lea.vmem %s43_s10, 4096  ;;  %p624_p6 = scmp.lt.s32.totalorder %s43_s10, %s43_s10 }
  0x2b   :  { %p620_p5 = scmp.ne.s32.totalorder %s43_s10, %s619_s27  ;;  %p625_p7 = scmp.lt.s32.totalorder %s619_s27, %s619_s27 }
  0x2d   :  { %p626_p8 = por %p625_p7, %p624_p6 }
  0x2f   :  { %p627_p9 = pnand %p626_p8, %p620_p5 }
  0x31   :  { %630 = shalt.err (!%p627_p9)
}
  0x32   :  { %48 = dma.hbm_to_vmem [thread:$0]  %s759_s3, 4096, %s43_s10, [#allocation6], %s660_s28, %s660_s28, %s661_s29  }
  0x33   :  { %653 = dma.done.wait [#allocation3], 128  }
  0x34   :  { %654 = vsyncadd [#allocation3], 4294967168 }
  0x35   :  { %655 = dma.done.wait [#allocation6], 5120  }
  0x36   :  { %656 = vsyncadd [#allocation6], 4294962176  ;;  %v664_v0 = vmov 0   ;;  %v497_v1 = vld [vmem:[#allocation5 + $0x4] ss:$8 sps:$4 sm:$0xff]   ;;  %v61_v14 = vld [vmem:[#allocation2] sm:$0xff]  ;;  %v73_v43 = vlaneseq }
  0x37   :  { %159 = vmatprep.mubr.bf16.mxu0 %v664_v0  ;;  %v499_v2 = vld [vmem:[#allocation5] ss:$8 sps:$4 sm:$0xff]   ;;  %127 = vmatprep.subr.bf16.mxu0 %v497_v1  ;;  %v500_v3 = vld [vmem:[#allocation5 + $0x14] ss:$8 sps:$4 sm:$0xff]   ;;  %v502_v4 = vld [vmem:[#allocation5 + $0x10] ss:$8 sps:$4 sm:$0xff]   ;;  %v62_v16 = vpack.c.bf16 %v61_v14, %v61_v14 }
  0x38   :  { %128 = vmatpush1.bf16.msra.mxu0 %v499_v2  ;;  %v503_v5 = vld [vmem:[#allocation5 + $0x24] ss:$8 sps:$4 sm:$0xff]   ;;  %v505_v6 = vld [vmem:[#allocation5 + $0x20] ss:$8 sps:$4 sm:$0xff]   ;;  %v512_v9 = vld [vmem:[#allocation7 + $0x14] ss:$8 sps:$4 sm:$0xff]  }
  0x39   :  { %129 = vmatprep.subr.bf16.mxu0 %v500_v3  ;;  %v509_v7 = vld [vmem:[#allocation7 + $0x4] ss:$8 sps:$4 sm:$0xff]   ;;  %v511_v8 = vld [vmem:[#allocation7] ss:$8 sps:$4 sm:$0xff]   ;;  %v506_v10 = vld [vmem:[#allocation5 + $0x34] ss:$8 sps:$4 sm:$0xff]  }
  0x3a   :  { %388 = vmatprep.subr.bf16.mxu1 %v509_v7  ;;  %v514_v11 = vld [vmem:[#allocation7 + $0x10] ss:$8 sps:$4 sm:$0xff]   ;;  %v515_v13 = vld [vmem:[#allocation7 + $0x24] ss:$8 sps:$4 sm:$0xff]   ;;  %v517_v15 = vld [vmem:[#allocation7 + $0x20] ss:$8 sps:$4 sm:$0xff]  }
  0x3b   :  { %389 = vmatpush1.bf16.msra.mxu1 %v511_v8  ;;  %v508_v12 = vld [vmem:[#allocation5 + $0x30] ss:$8 sps:$4 sm:$0xff]   ;;  %v518_v17 = vld [vmem:[#allocation7 + $0x34] ss:$8 sps:$4 sm:$0xff]   ;;  %vm123_vm0 = vcmask 523264   ;;  %v74_v44 = vshrl.u32 %v73_v43, 7 }
  0x3c   :  { %130 = vmatpush1.bf16.msra.mxu0 %v502_v4  ;;  %390 = vmatprep.subr.bf16.mxu1 %v512_v9  ;;  %v520_v18 = vld [vmem:[#allocation7 + $0x30] ss:$8 sps:$4 sm:$0xff]   ;;  %v521_v19 = vld [vmem:[#allocation7 + $0x44] ss:$8 sps:$4 sm:$0xff]   ;;  %v523_v20 = vld [vmem:[#allocation7 + $0x40] ss:$8 sps:$4 sm:$0xff]  }
  0x3d   :  { %131 = vmatprep.subr.bf16.mxu0 %v503_v5  ;;  %v524_v21 = vld [vmem:[#allocation7 + $0x54] ss:$8 sps:$4 sm:$0xff]   ;;  %v526_v22 = vld [vmem:[#allocation7 + $0x50] ss:$8 sps:$4 sm:$0xff]   ;;  %v527_v23 = vld [vmem:[#allocation7 + $0x64] ss:$8 sps:$4 sm:$0xff]  }
  0x3e   :  { %v529_v24 = vld [vmem:[#allocation7 + $0x60] ss:$8 sps:$4 sm:$0xff]   ;;  %v530_v25 = vld [vmem:[#allocation7 + $0x74] ss:$8 sps:$4 sm:$0xff]   ;;  %v532_v26 = vld [vmem:[#allocation7 + $0x70] ss:$8 sps:$4 sm:$0xff]  }
  0x3f   :  { %391 = vmatpush1.bf16.msra.mxu1 %v514_v11  ;;  %v533_v27 = vld [vmem:[#allocation7 + $0x84] ss:$8 sps:$4 sm:$0xff]   ;;  %v535_v28 = vld [vmem:[#allocation7 + $0x80] ss:$8 sps:$4 sm:$0xff]   ;;  %v536_v29 = vld [vmem:[#allocation7 + $0x94] ss:$8 sps:$4 sm:$0xff]  }
  0x40   :  { %132 = vmatpush1.bf16.msra.mxu0 %v505_v6  ;;  %392 = vmatprep.subr.bf16.mxu1 %v515_v13  ;;  %v538_v30 = vld [vmem:[#allocation7 + $0x90] ss:$8 sps:$4 sm:$0xff]   ;;  %v539_v31 = vld [vmem:[#allocation7 + $0xa4] ss:$8 sps:$4 sm:$0xff]   ;;  %v541_v32 = vld [vmem:[#allocation7 + $0xa0] ss:$8 sps:$4 sm:$0xff]  }
  0x41   :  { %133 = vmatprep.subr.bf16.mxu0 %v506_v10  ;;  %v542_v33 = vld [vmem:[#allocation7 + $0xb4] ss:$8 sps:$4 sm:$0xff]   ;;  %v544_v34 = vld [vmem:[#allocation7 + $0xb0] ss:$8 sps:$4 sm:$0xff]   ;;  %v545_v35 = vld [vmem:[#allocation7 + $0xc4] ss:$8 sps:$4 sm:$0xff]  }
  0x42   :  { %v547_v36 = vld [vmem:[#allocation7 + $0xc0] ss:$8 sps:$4 sm:$0xff]   ;;  %v548_v37 = vld [vmem:[#allocation7 + $0xd4] ss:$8 sps:$4 sm:$0xff]   ;;  %v550_v38 = vld [vmem:[#allocation7 + $0xd0] ss:$8 sps:$4 sm:$0xff]  }
  0x43   :  { %393 = vmatpush1.bf16.msra.mxu1 %v517_v15  ;;  %v551_v39 = vld [vmem:[#allocation7 + $0xe4] ss:$8 sps:$4 sm:$0xff]   ;;  %v553_v40 = vld [vmem:[#allocation7 + $0xe0] ss:$8 sps:$4 sm:$0xff]   ;;  %v554_v41 = vld [vmem:[#allocation7 + $0xf4] ss:$8 sps:$4 sm:$0xff]  }
  0x44   :  { %134 = vmatpush1.bf16.msra.mxu0 %v508_v12  ;;  %394 = vmatprep.subr.bf16.mxu1 %v518_v17  ;;  %v556_v42 = vld [vmem:[#allocation7 + $0xf0] ss:$8 sps:$4 sm:$0xff]   ;;  %v75_v45 = vsub.s32 0, %v74_v44  ;;  %v79_v47 = vsub.s32 1, %v74_v44  ;;  %s665_s6 = smov [#allocation8]  }
  0x45   :  { %v71_v46 = vld [vmem:[%s758_s2] sm:$0x3]  ;;  %s437_s7 = sshll.u32 %s665_s6, 4  ;;  %s438_s7 = int_to_ptr.vmem [resolvable:$true] %s437_s7 }
  0x46   :  { %v76_v48 = vrot.slane %v71_v46, %v75_v45  ;;  %v80_v49 = vrot.slane %v71_v46, %v79_v47  ;;  %v216_v4 = vld [vmem:[%s760_s4] sm:$0x3]  ;;  %s631_s8 = scalar_lea.vmem %s438_s7, 256  ;;  %p636_p11 = scmp.lt.s32.totalorder %s438_s7, %s438_s7 }
  0x47   :  { %455 = vmatmul.mubr.msk.bf16.vlgmr.msra.gmra.mrb[0].mxu0 %vm123_vm0, %v62_v16  ;;  %395 = vmatpush1.bf16.msra.mxu1 %v520_v18  ;;  %v221_v5 = vrot.slane %v216_v4, %v75_v45  ;;  %v225_v6 = vrot.slane %v216_v4, %v79_v47  ;;  %p632_p10 = scmp.ne.s32.totalorder %s438_s7, %s631_s8  ;;  %p637_p12 = scmp.lt.s32.totalorder %s631_s8, %s631_s8 }
  0x48   :  { %396 = vmatprep.subr.bf16.mxu1 %v521_v19 }
  0x49   :  { %p638_p13 = por %p637_p12, %p636_p11 }
  0x4b   :  { %397 = vmatpush1.bf16.msra.mxu1 %v523_v20  ;;  %p639_p0 = pnand %p638_p13, %p632_p10 }
  0x4c   :  { %398 = vmatprep.subr.bf16.mxu1 %v524_v21 }
  0x4f   :  { %399 = vmatpush1.bf16.msra.mxu1 %v526_v22 }
  0x50   :  { %400 = vmatprep.subr.bf16.mxu1 %v527_v23 }
  0x53   :  { %401 = vmatpush1.bf16.msra.mxu1 %v529_v24 }
  0x54   :  { %402 = vmatprep.subr.bf16.mxu1 %v530_v25 }
  0x57   :  { %403 = vmatpush1.bf16.msra.mxu1 %v532_v26 }
  0x58   :  { %404 = vmatprep.subr.bf16.mxu1 %v533_v27 }
  0x5b   :  { %405 = vmatpush1.bf16.msra.mxu1 %v535_v28 }
  0x5c   :  { %406 = vmatprep.subr.bf16.mxu1 %v536_v29 }
  0x5f   :  { %407 = vmatpush1.bf16.msra.mxu1 %v538_v30 }
  0x60   :  { %408 = vmatprep.subr.bf16.mxu1 %v539_v31 }
  0x63   :  { %409 = vmatpush1.bf16.msra.mxu1 %v541_v32 }
  0x64   :  { %410 = vmatprep.subr.bf16.mxu1 %v542_v33 }
  0x67   :  { %411 = vmatpush1.bf16.msra.mxu1 %v544_v34 }
  0x68   :  { %412 = vmatprep.subr.bf16.mxu1 %v545_v35 }
  0x6b   :  { %413 = vmatpush1.bf16.msra.mxu1 %v547_v36 }
  0x6c   :  { %414 = vmatprep.subr.bf16.mxu1 %v548_v37 }
  0x6f   :  { %415 = vmatpush1.bf16.msra.mxu1 %v550_v38 }
  0x70   :  { %416 = vmatprep.subr.bf16.mxu1 %v551_v39 }
  0x73   :  { %417 = vmatpush1.bf16.msra.mxu1 %v553_v40 }
  0x74   :  { %418 = vmatprep.subr.bf16.mxu1 %v554_v41 }
  0x77   :  { %419 = vmatpush1.bf16.msra.mxu1 %v556_v42 }
 0x11a   :  { %v161_v50 = vpop.f32.mrb[0].mxu0 }
 0x11b   :  { %v162_v51 = vadd.f32 %v161_v50, %v76_v48  ;;  %v163_v52 = vpop.f32.mrb[1].mxu0 }
 0x11c   :  { %v164_v53 = vadd.f32 %v163_v52, %v80_v49  ;;  %v165_v54 = vpop.f32.mrb[2].mxu0 }
 0x11d   :  { %v456_v55 = vmul.f32 -1.442695, %v162_v51  ;;  %v166_v56 = vpop.f32.mrb[3].mxu0 }
 0x11e   :  { %v457_v57 = vmul.f32 -1.442695, %v164_v53 }
 0x11f   :  { %557 = vpow2.f32 %v456_v55 }
 0x120   :  { %559 = vpow2.f32 %v457_v57 }
 0x129   :  { %v558_v58 = vpop.eup %557 }
 0x12a   :  { %v560_v59 = vpop.eup %559  ;;  %v174_v60 = vadd.f32 1.0, %v558_v58 }
 0x12b   :  { %v175_v61 = vadd.f32 1.0, %v560_v59 }
 0x12c   :  { %561 = vrcp.f32 %v174_v60 }
 0x12d   :  { %563 = vrcp.f32 %v175_v61 }
 0x136   :  { %v562_v62 = vpop.eup %561 }
 0x137   :  { %v564_v63 = vpop.eup %563  ;;  %v180_v0 = vmul.f32 %v562_v62, %v162_v51 }
 0x138   :  { %v181_v1 = vmul.f32 %v564_v63, %v164_v53 }
 0x139   :  { %v182_v3 = vpack.c.bf16 %v180_v0, %v180_v0 }
 0x13a   :  { %v183_v2 = vpack.c.bf16 %v181_v1, %v181_v1 }
 0x13c   :  { %420 = vmatprep.mubr.bf16.mxu1 %v183_v2 }
 0x13d   :  { %421 = vmatmul.mubr.bf16.vlgmr.msra.gmra.mrb[0].mxu1 %v182_v3 }
 0x210   :  { %v422_v7 = vpop.f32.mrb[0].mxu1 }
 0x211   :  { %v423_v8 = vadd.f32 %v422_v7, %v221_v5  ;;  %v424_v9 = vpop.f32.mrb[1].mxu1 }
 0x212   :  { %v425_v10 = vadd.f32 %v424_v9, %v225_v6  ;;  %v426_v11 = vpop.f32.mrb[2].mxu1 }
 0x213   :  { %429 = vst [vmem:[#allocation8] sm:$0xff] %v423_v8  ;;  %v427_v12 = vpop.f32.mrb[3].mxu1 }
 0x214   :  { %430 = vst [vmem:[#allocation8 + $0x8] sm:$0xff] %v425_v10 }
 0x215   :  { %642 = shalt.err (!%p639_p0)
}
 0x216   :  { %s643_s10 = scalar_lea.hbm %s761_s5, 256 }
 0x217   :  { %p644_p1 = scmp.ne.s32.totalorder %s761_s5, %s643_s10  ;;  %p647_p2 = scmp.lt.u32.totalorder %s643_s10, %s761_s5 }
 0x219   :  { %p649_p3 = pnand %p647_p2, %p644_p1 }
 0x21b   :  { %652 = shalt.err (!%p649_p3)
}
 0x21c   :  { %440 = dma.vmem_to_hbm [thread:$0]  %s438_s7, 256, %s761_s5, [#allocation4]  }
 0x21d   :  { %657 = dma.done.wait [#allocation4], 256  }
 0x21e   :  { %658 = vsyncadd [#allocation4], 4294967040 }
 0x21f   :  { %444 = vsyncpa [#allocation3], 1 }
 0x220   :  { %445 = vsyncpa [#allocation6], 1 }
 0x221   :  { %446 = vsyncpa [#allocation4], 1 }

</bundles_post_ra>
